<compile_context>
chip_gen: v7x
topology: tpu7x:2x2x1
jax: 0.10.0
libtpu: 0.0.40
codegen_flags: <defaults>
</compile_context>

<pallas_src>
import functools

import jax
import jax.numpy as jnp
from jax.experimental import pallas as pl
from jax.experimental.pallas import tpu as pltpu

LANE = 128
SUBLANE = 8
CHUNK = SUBLANE * LANE              # 1024: kernel-prefix granularity
DESIRED_BLOCK_ROWS = 8192           # 8192 x 128 f32 = 4 MiB per input per step
SMALL_INPUT_THRESHOLD = 128 * 1024  # below this, plain jnp beats launch cost


def _jnp_loss_sum(r, f, gamma):
    """Exact per-element loss, summed in f32 (plain jnp)."""
    vals = (-jnp.log(r.astype(jnp.float32))
            - gamma * jnp.log(1.0 - f.astype(jnp.float32)))
    return jnp.sum(vals, dtype=jnp.float32)


def _num_tensorcores():
    """Best-effort TensorCore count per chip; 2 is a safe fallback."""
    try:
        info = pltpu.get_tpu_info()
        for name in ("num_cores", "core_count", "tensorcore_count",
                     "num_tensorcores", "cores_per_chip"):
            v = getattr(info, name, None)
            if isinstance(v, int) and 1 <= v <= 16:
                return v
    except Exception:
        pass
    # TODO(synk): verify "parallel" dimension_semantics shards this axis across
    # both v7x TensorCores; if not, switch the axis to pltpu.CORE_PARALLEL.
    return 2


def _disc_fgan_loss_kernel(real_ref, fake_ref, out_ref, *, gamma, valid_rows,
                           block_rows, blocks_per_split, last_block):
    s = pl.program_id(0)   # parallel split (megacore on v7x)
    j = pl.program_id(1)   # reduction over row-blocks within this split

    # out_ref is the (8, LANE) resident accumulator for this split.
    @pl.when(j == 0)
    def _():
        out_ref[...] = jnp.zeros_like(out_ref)

    r = real_ref[...].astype(jnp.float32)
    f = fake_ref[...].astype(jnp.float32)
    # Exact formula (no gamma==1 log-fusion): matches the PyTorch reference
    # even for extreme discriminator outputs. Kernel is HBM-bound; the extra
    # log rides the otherwise-idle EUP slot.
    vals = -jnp.log(r) - gamma * jnp.log(1.0 - f)

    blk = s * blocks_per_split + j

    # Interior blocks: plain unmasked fold into the (8, LANE) accumulator.
    @pl.when(blk < last_block)
    def _():
        out_ref[...] += vals.reshape(-1, SUBLANE, LANE).sum(axis=0)

    # Tail block (and any clamped duplicate block when blocks_total does not
    # split evenly): row-only mask. Lane padding never exists because the
    # wrapper feeds an exact multiple-of-1024 prefix. jnp.where is a select,
    # so NaN/Inf from garbage rows of a partial block never reach the sum.
    @pl.when(blk >= last_block)
    def _():
        row = jax.lax.broadcasted_iota(jnp.int32, (block_rows, LANE), 0)
        mask = (blk * block_rows + row) < valid_rows
        out_ref[...] += jnp.where(mask, vals, 0.0).reshape(
            -1, SUBLANE, LANE).sum(axis=0)


def disc_fgan_loss(d_out_real, d_out_fake, gamma=1.0, *,
                   desired_block_rows=DESIRED_BLOCK_ROWS,
                   force_pallas=False):
    """Pallas implementation of DiscFGANLoss.forward. Returns scalar f32."""
    assert d_out_real.shape == d_out_fake.shape, "inputs must have same shape"
    gamma = float(gamma)
    total = int(d_out_real.size)

    real_flat = d_out_real.reshape(-1)
    fake_flat = d_out_fake.reshape(-1)

    # Small-input fast path: pallas_call launch/DMA setup dominates here.
    if total < SMALL_INPUT_THRESHOLD and not force_pallas:
        return _jnp_loss_sum(real_flat, fake_flat, gamma) / total

    # Split off the <=1023-element ragged tail so the kernel sees an exact
    # (rows multiple of 8) x 128 slab — no O(N) pad copy, no lane masking.
    rem = total % CHUNK
    main = total - rem
    if main == 0:
        return _jnp_loss_sum(real_flat, fake_flat, gamma) / total

    if rem:
        tail_sum = _jnp_loss_sum(real_flat[main:], fake_flat[main:], gamma)
        real_main = real_flat[:main]
        fake_main = fake_flat[:main]
    else:
        tail_sum = jnp.zeros((), jnp.float32)
        real_main = real_flat
        fake_main = fake_flat

    m = main // LANE                       # multiple of 8 by construction
    real2d = real_main.reshape(m, LANE)    # metadata-only reshape
    fake2d = fake_main.reshape(m, LANE)

    block_rows = m if m <= desired_block_rows else int(desired_block_rows)
    assert block_rows % SUBLANE == 0
    blocks_total = pl.cdiv(m, block_rows)
    n_splits = max(1, min(_num_tensorcores(), blocks_total))
    bps = pl.cdiv(blocks_total, n_splits)
    last_block = blocks_total - 1

    def in_map(s, j):
        # Clamp overrun blocks (when blocks_total % n_splits != 0) onto a valid
        # block; their contribution is masked to zero in the kernel.
        return (jnp.minimum(s * bps + j, last_block), 0)

    kernel = functools.partial(
        _disc_fgan_loss_kernel,
        gamma=gamma,
        valid_rows=m,
        block_rows=block_rows,
        blocks_per_split=bps,
        last_block=last_block,
    )

    itemsize = d_out_real.dtype.itemsize + d_out_fake.dtype.itemsize
    cost = pl.CostEstimate(
        flops=5 * main,
        transcendentals=2 * main,
        bytes_accessed=main * itemsize + n_splits * SUBLANE * LANE * 4,
    )

    partials = pl.pallas_call(
        kernel,
        out_shape=jax.ShapeDtypeStruct((n_splits * SUBLANE, LANE), jnp.float32),
        grid_spec=pltpu.PrefetchScalarGridSpec(
            num_scalar_prefetch=0,
            grid=(n_splits, bps),
            in_specs=[
                pl.BlockSpec((block_rows, LANE), in_map),
                pl.BlockSpec((block_rows, LANE), in_map),
            ],
            out_specs=pl.BlockSpec((SUBLANE, LANE), lambda s, j: (s, 0)),
        ),
        compiler_params=pltpu.CompilerParams(
            dimension_semantics=("parallel", "arbitrary"),
            vmem_limit_bytes=32 * 1024 * 1024,
        ),
        cost_estimate=cost,
    )(real2d, fake2d)

    return (jnp.sum(partials, dtype=jnp.float32) + tail_sum) / total


def disc_fgan_loss_ref(d_out_real, d_out_fake, gamma=1.0):
    return jnp.mean(
        -jnp.log(d_out_real)
        - gamma * jnp.log(jnp.ones_like(d_out_fake) - d_out_fake)
    )


if __name__ == "__main__":
    key = jax.random.PRNGKey(0)
    keys = jax.random.split(key, 8)

    def check(r, f, gamma, **kw):
        got = jax.block_until_ready(disc_fgan_loss(r, f, gamma, **kw))
        want = disc_fgan_loss_ref(r, f, gamma)
        assert jnp.allclose(got, want, rtol=1e-5, atol=1e-5), (got, want, gamma, r.shape)

    # 1) Canonical small NCHW discriminator output, forced through the kernel.
    shape1 = (2, 4, 16, 16)
    r1 = jax.random.uniform(keys[0], shape1, jnp.float32, minval=0.05, maxval=0.95)
    f1 = jax.random.uniform(keys[1], shape1, jnp.float32, minval=0.05, maxval=0.95)
    check(r1, f1, 1.0, force_pallas=True)

    # 2) Misaligned size (1530 = 1024-element kernel prefix + 506-element jnp
    #    tail), gamma != 1.
    shape2 = (2, 3, 15, 17)
    r2 = jax.random.uniform(keys[2], shape2, jnp.float32, minval=0.05, maxval=0.95)
    f2 = jax.random.uniform(keys[3], shape2, jnp.float32, minval=0.05, maxval=0.95)
    check(r2, f2, 0.5, force_pallas=True)

    # 3) Multi-block path: partial last block + clamped duplicate block on the
    #    2-way split (small data via a small block_rows override).
    shape3 = (2, 4, 32, 32)
    r3 = jax.random.uniform(keys[4], shape3, jnp.float32, minval=0.05, maxval=0.95)
    f3 = jax.random.uniform(keys[5], shape3, jnp.float32, minval=0.05, maxval=0.95)
    check(r3, f3, 2.0, force_pallas=True, desired_block_rows=24)

    # 4) Default path at/above the small-input threshold (no force).
    shape4 = (4, 8, 64, 64)
    r4 = jax.random.uniform(keys[6], shape4, jnp.float32, minval=0.05, maxval=0.95)
    f4 = jax.random.uniform(keys[7], shape4, jnp.float32, minval=0.05, maxval=0.95)
    check(r4, f4, 1.0)

    print("KERNEL_OK")
</pallas_src>

<mosaic_0001>
module attributes {stable_mosaic.version = 11 : i64} {
  func.func @_disc_fgan_loss_kernel(%arg0: i32, %arg1: i32, %arg2: memref<16x128xf32, #tpu.memory_space<vmem>>, %arg3: memref<16x128xf32, #tpu.memory_space<vmem>>, %arg4: memref<8x128xf32, #tpu.memory_space<vmem>>) attributes {dimension_semantics = [#tpu.dimension_semantics<parallel>, #tpu.dimension_semantics<arbitrary>], iteration_bounds = array<i64: 1, 1>, scalar_prefetch = 0 : i64, scratch_operands = 0 : i64, tpu.core_type = #tpu.core_type<tc>, window_params = [{transform_indices = @transform_0, window_bounds = array<i64: 16, 128>}, {transform_indices = @transform_1, window_bounds = array<i64: 16, 128>}, {transform_indices = @transform_2, window_bounds = array<i64: 8, 128>}]} {
    %c0_i32 = arith.constant 0 : i32
    %0 = arith.cmpi eq, %arg1, %c0_i32 : i32
    %1 = arith.extui %0 : i1 to i32
    %c0_i32_0 = arith.constant 0 : i32
    %2 = arith.cmpi ne, %1, %c0_i32_0 : i32
    scf.if %2 {
      %cst_10 = arith.constant 0.000000e+00 : f32
      %22 = vector.broadcast %cst_10 : f32 to vector<8x128xf32>
      %c0_11 = arith.constant 0 : index
      %c0_12 = arith.constant 0 : index
      %23 = vector.load %arg4[%c0_11, %c0_12] : memref<8x128xf32, #tpu.memory_space<vmem>>, vector<8x128xf32>
      tpu.vector_store %arg4[%c0_11, %c0_12], %22 {strides = array<i32>} : memref<8x128xf32, #tpu.memory_space<vmem>>, vector<8x128xf32>,
    } else {
    }
    %c0 = arith.constant 0 : index
    %c0_1 = arith.constant 0 : index
    %3 = vector.load %arg2[%c0, %c0_1] : memref<16x128xf32, #tpu.memory_space<vmem>>, vector<16x128xf32>
    %c0_2 = arith.constant 0 : index
    %c0_3 = arith.constant 0 : index
    %4 = vector.load %arg3[%c0_2, %c0_3] : memref<16x128xf32, #tpu.memory_space<vmem>>, vector<16x128xf32>
    %5 = math.log %3 : vector<16x128xf32>
    %cst = arith.constant 0.000000e+00 : f32
    %6 = vector.broadcast %cst : f32 to vector<16x128xf32>
    %7 = arith.subf %6, %5 : vector<16x128xf32>
    %cst_4 = arith.constant 1.000000e+00 : f32
    %8 = vector.broadcast %cst_4 : f32 to vector<16x128xf32>
    %9 = arith.subf %8, %4 : vector<16x128xf32>
    %10 = math.log %9 : vector<16x128xf32>
    %cst_5 = arith.constant 1.000000e+00 : f32
    %11 = vector.broadcast %cst_5 : f32 to vector<16x128xf32>
    %12 = arith.mulf %11, %10 : vector<16x128xf32>
    %13 = arith.subf %7, %12 : vector<16x128xf32>
    %c1_i32 = arith.constant 1 : i32
    %14 = arith.muli %arg0, %c1_i32 : i32
    %15 = arith.addi %14, %arg1 : i32
    %c0_i32_6 = arith.constant 0 : i32
    %16 = arith.cmpi slt, %15, %c0_i32_6 : i32
    %17 = arith.extui %16 : i1 to i32
    %c0_i32_7 = arith.constant 0 : i32
    %18 = arith.cmpi ne, %17, %c0_i32_7 : i32
    scf.if %18 {
      %c0_10 = arith.constant 0 : index
      %c0_11 = arith.constant 0 : index
      %22 = vector.load %arg4[%c0_10, %c0_11] : memref<8x128xf32, #tpu.memory_space<vmem>>, vector<8x128xf32>
      %23 = vector.shape_cast %13 : vector<16x128xf32> to vector<2x8x128xf32>
      %cst_12 = arith.constant dense<0.000000e+00> : vector<8x128xf32>
      %24 = vector.multi_reduction <add>, %23, %cst_12 [0] : vector<2x8x128xf32> to vector<8x128xf32>
      %25 = arith.addf %22, %24 : vector<8x128xf32>
      %c0_13 = arith.constant 0 : index
      %c0_14 = arith.constant 0 : index
      %26 = vector.load %arg4[%c0_13, %c0_14] : memref<8x128xf32, #tpu.memory_space<vmem>>, vector<8x128xf32>
      tpu.vector_store %arg4[%c0_13, %c0_14], %25 {strides = array<i32>} : memref<8x128xf32, #tpu.memory_space<vmem>>, vector<8x128xf32>,
    } else {
    }
    %c0_i32_8 = arith.constant 0 : i32
    %19 = arith.cmpi sge, %15, %c0_i32_8 : i32
    %20 = arith.extui %19 : i1 to i32
    %c0_i32_9 = arith.constant 0 : i32
    %21 = arith.cmpi ne, %20, %c0_i32_9 : i32
    scf.if %21 {
      %22 = tpu.iota {dimensions = array<i32: 0>} : vector<16x128xi32>
      %c16_i32 = arith.constant 16 : i32
      %23 = arith.muli %15, %c16_i32 : i32
      %24 = vector.broadcast %23 : i32 to vector<16x128xi32>
      %25 = arith.addi %24, %22 : vector<16x128xi32>
      %c16_i32_10 = arith.constant 16 : i32
      %26 = vector.broadcast %c16_i32_10 : i32 to vector<16x128xi32>
      %27 = arith.cmpi slt, %25, %26 : vector<16x128xi32>
      %c0_11 = arith.constant 0 : index
      %c0_12 = arith.constant 0 : index
      %28 = vector.load %arg4[%c0_11, %c0_12] : memref<8x128xf32, #tpu.memory_space<vmem>>, vector<8x128xf32>
      %cst_13 = arith.constant 0.000000e+00 : f32
      %29 = vector.broadcast %cst_13 : f32 to vector<16x128xf32>
      %30 = arith.select %27, %13, %29 : vector<16x128xi1>, vector<16x128xf32>
      %31 = vector.shape_cast %30 : vector<16x128xf32> to vector<2x8x128xf32>
      %cst_14 = arith.constant dense<0.000000e+00> : vector<8x128xf32>
      %32 = vector.multi_reduction <add>, %31, %cst_14 [0] : vector<2x8x128xf32> to vector<8x128xf32>
      %33 = arith.addf %28, %32 : vector<8x128xf32>
      %c0_15 = arith.constant 0 : index
      %c0_16 = arith.constant 0 : index
      %34 = vector.load %arg4[%c0_15, %c0_16] : memref<8x128xf32, #tpu.memory_space<vmem>>, vector<8x128xf32>
      tpu.vector_store %arg4[%c0_15, %c0_16], %33 {strides = array<i32>} : memref<8x128xf32, #tpu.memory_space<vmem>>, vector<8x128xf32>,
    } else {
    }
    return
  }
  func.func @transform_0(%arg0: i32, %arg1: i32) -> (i32, i32) {
    %c1_i32 = arith.constant 1 : i32
    %0 = arith.muli %arg0, %c1_i32 : i32
    %1 = arith.addi %0, %arg1 : i32
    %c0_i32 = arith.constant 0 : i32
    %2 = arith.minsi %1, %c0_i32 : i32
    %c0_i32_0 = arith.constant 0 : i32
    %c0_i32_1 = arith.constant 0 : i32
    return %2, %c0_i32_0 : i32, i32
  }
  func.func @transform_1(%arg0: i32, %arg1: i32) -> (i32, i32) {
    %c1_i32 = arith.constant 1 : i32
    %0 = arith.muli %arg0, %c1_i32 : i32
    %1 = arith.addi %0, %arg1 : i32
    %c0_i32 = arith.constant 0 : i32
    %2 = arith.minsi %1, %c0_i32 : i32
    %c0_i32_0 = arith.constant 0 : i32
    %c0_i32_1 = arith.constant 0 : i32
    return %2, %c0_i32_0 : i32, i32
  }
  func.func @transform_2(%arg0: i32, %arg1: i32) -> (i32, i32) {
    %c0_i32 = arith.constant 0 : i32
    %c0_i32_0 = arith.constant 0 : i32
    return %arg0, %c0_i32 : i32, i32
  }
}

</mosaic_0001>

<bundles_post_ra>
// kernel: tpu_custom_call.1
= control target key start
LH: loop header
LB: loop body
LE: loop exit
PB: predicated region body
PF: predicated region fallthrough
CT: control target
= control target key end

     0   :  { %7 = vsyncpa [#allocation3], 0  ;;  %s273_s0 = inlined_call_operand.hbm [shape: f32[16,128], index: 0, kind: input, shape index: {}]   ;;  %s274_s1 = inlined_call_operand.hbm [shape: f32[16,128], index: 1, kind: input, shape index: {}]   ;;  %s275_s2 = inlined_call_operand.hbm [shape: f32[8,128], index: 2, kind: output, shape index: {}]  }
   0x1   :  { %8 = vsyncpa [#allocation6], 0 }
   0x2   :  { %9 = vsyncpa [#allocation4], 0  ;;  %s217_s9 = smov [#allocation2]   ;;  %s145_s13 = scalar_lea.hbm %s273_s0, 256 }
   0x3   :  { %s21_s10 = sshll.u32 %s217_s9, 4  ;;  %p146_p0 = scmp.ne.s32.totalorder %s273_s0, %s145_s13  ;;  %s22_s10 = int_to_ptr.vmem [resolvable:$true] %s21_s10 }
   0x4   :  { %p149_p1 = scmp.lt.u32.totalorder %s145_s13, %s273_s0 }
   0x6   :  { %p151_p2 = pnand %p149_p1, %p146_p0 }
   0x8   :  { %154 = shalt.err (!%p151_p2)
}
   0x9   :  { %s155_s18 = scalar_lea.vmem %s22_s10, 256  ;;  %p160_p4 = scmp.lt.s32.totalorder %s22_s10, %s22_s10 }
   0xa   :  { %p156_p3 = scmp.ne.s32.totalorder %s22_s10, %s155_s18  ;;  %p161_p5 = scmp.lt.s32.totalorder %s155_s18, %s155_s18 }
   0xc   :  { %p162_p6 = por %p161_p5, %p160_p4 }
   0xe   :  { %p163_p7 = pnand %p162_p6, %p156_p3 }
  0x10   :  { %166 = shalt.err (!%p163_p7)
}
  0x11   :  { %s218_s19 = smov 128   ;;  %s219_s20 = smov 8  }
  0x12   :  { %27 = dma.hbm_to_vmem [thread:$0]  %s273_s0, 256, %s22_s10, [#allocation3], %s218_s19, %s218_s19, %s219_s20  }
  0x13   :  { %s220_s23 = smov [#allocation5]   ;;  %s167_s27 = scalar_lea.hbm %s274_s1, 256 }
  0x14   :  { %s39_s24 = sshll.u32 %s220_s23, 4  ;;  %p168_p8 = scmp.ne.s32.totalorder %s274_s1, %s167_s27  ;;  %s40_s24 = int_to_ptr.vmem [resolvable:$true] %s39_s24 }
  0x15   :  { %p171_p9 = scmp.lt.u32.totalorder %s167_s27, %s274_s1 }
  0x17   :  { %p173_p10 = pnand %p171_p9, %p168_p8 }
  0x19   :  { %176 = shalt.err (!%p173_p10)
}
  0x1a   :  { %s177_s4 = scalar_lea.vmem %s40_s24, 256  ;;  %p182_p12 = scmp.lt.s32.totalorder %s40_s24, %s40_s24 }
  0x1b   :  { %p178_p11 = scmp.ne.s32.totalorder %s40_s24, %s177_s4  ;;  %p183_p13 = scmp.lt.s32.totalorder %s177_s4, %s177_s4 }
  0x1d   :  { %p184_p0 = por %p183_p13, %p182_p12 }
  0x1f   :  { %p185_p1 = pnand %p184_p0, %p178_p11 }
  0x21   :  { %188 = shalt.err (!%p185_p1)
}
  0x22   :  { %45 = dma.hbm_to_vmem [thread:$0]  %s274_s1, 256, %s40_s24, [#allocation6], %s218_s19, %s218_s19, %s219_s20  }
  0x23   :  { %211 = dma.done.wait [#allocation3], 256  }
  0x24   :  { %212 = vsyncadd [#allocation3], 4294967040 }
  0x25   :  { %213 = dma.done.wait [#allocation6], 256  }
  0x26   :  { %214 = vsyncadd [#allocation6], 4294967040  ;;  %v65_v0 = vld [vmem:[#allocation2] sm:$0xff]  ;;  %v66_v1 = vld [vmem:[#allocation2 + $0x8] sm:$0xff]  ;;  %s221_s1 = smov [#allocation7]  }
  0x27   :  { %v67_v2 = vld [vmem:[#allocation5] sm:$0xff]  ;;  %v68_v3 = vld [vmem:[#allocation5 + $0x8] sm:$0xff]  ;;  %137 = vlog2.f32 %v65_v0  ;;  %s117_s6 = sshll.u32 %s221_s1, 4  ;;  %s118_s6 = int_to_ptr.vmem [resolvable:$true] %s117_s6 }
  0x28   :  { %v75_v4 = vsub.f32 1.0, %v67_v2  ;;  %139 = vlog2.f32 %v66_v1  ;;  %v76_v5 = vsub.f32 1.0, %v68_v3  ;;  %s189_s7 = scalar_lea.vmem %s118_s6, 128  ;;  %p194_p3 = scmp.lt.s32.totalorder %s118_s6, %s118_s6 }
  0x29   :  { %p190_p2 = scmp.ne.s32.totalorder %s118_s6, %s189_s7  ;;  %p195_p4 = scmp.lt.s32.totalorder %s189_s7, %s189_s7 }
  0x2a   :  { %141 = vlog2.f32 %v75_v4 }
  0x2b   :  { %143 = vlog2.f32 %v76_v5  ;;  %p196_p5 = por %p195_p4, %p194_p3 }
  0x2d   :  { %p197_p6 = pnand %p196_p5, %p190_p2 }
  0x31   :  { %v138_v6 = vpop.eup %137 }
  0x32   :  { %v140_v7 = vpop.eup %139  ;;  %v70_v8 = vmul.f32 0.6931472, %v138_v6 }
  0x33   :  { %v72_v10 = vmul.f32 0.6931472, %v140_v7 }
  0x34   :  { %v142_v9 = vpop.eup %141  ;;  %v73_v12 = vsub.f32 0.0, %v70_v8 }
  0x35   :  { %v144_v11 = vpop.eup %143  ;;  %v78_v13 = vmul.f32 0.6931472, %v142_v9  ;;  %v74_v14 = vsub.f32 0.0, %v72_v10 }
  0x36   :  { %v80_v15 = vmul.f32 0.6931472, %v144_v11 }
  0x37   :  { %v81_v16 = vsub.f32 %v73_v12, %v78_v13 }
  0x38   :  { %v82_v17 = vsub.f32 %v74_v14, %v80_v15 }
  0x3a   :  { %v108_v18 = vadd.f32 %v82_v17, %v81_v16 }
  0x3c   :  { %110 = vst [vmem:[#allocation7] sm:$0xff] %v108_v18 }
  0x3d   :  { %200 = shalt.err (!%p197_p6)
}
  0x3e   :  { %s201_s10 = scalar_lea.hbm %s275_s2, 128 }
  0x3f   :  { %p202_p7 = scmp.ne.s32.totalorder %s275_s2, %s201_s10  ;;  %p205_p8 = scmp.lt.u32.totalorder %s201_s10, %s275_s2 }
  0x41   :  { %p207_p9 = pnand %p205_p8, %p202_p7 }
  0x43   :  { %210 = shalt.err (!%p207_p9)
}
  0x44   :  { %120 = dma.vmem_to_hbm [thread:$0]  %s118_s6, 128, %s275_s2, [#allocation4]  }
  0x45   :  { %215 = dma.done.wait [#allocation4], 128  }
  0x46   :  { %216 = vsyncadd [#allocation4], 4294967168 }
  0x47   :  { %124 = vsyncpa [#allocation3], 1 }
  0x48   :  { %125 = vsyncpa [#allocation6], 1 }
  0x49   :  { %126 = vsyncpa [#allocation4], 1 }

</bundles_post_ra>
